<compile_context>
chip_gen: v7x
topology: tpu7x:2x2x1
jax: 0.10.0
libtpu: 0.0.40
codegen_flags: <defaults>
</compile_context>

<pallas_src>
import jax
import jax.numpy as jnp
from jax.experimental import pallas as pl
from jax.experimental.pallas import tpu as pltpu

LATENT_DIM = (32, 32, 32, 1)     # module default -> total_latent_dim = 97
NUM_LAYERS = len(LATENT_DIM)
OUTPUT_DIM = 16
NUM_NODE_FEATS = 8
NUM_GRAPHS = 2                   # graphs per mini-batch
NODES_PER_GRAPH = 8
N_TOTAL = NUM_GRAPHS * NODES_PER_GRAPH
BATCH = 4                        # independent graph mini-batches per launch

FEAT_PAD = 128                   # lane-dense activation / contraction width
OUT_PAD = 128                    # lane-dense output width (16 -> 128)


# ---------------------------------------------------------------------------
# Fused kernel: 4 graph-conv layers + per-graph max pool + output linear + relu
# One grid step == one graph mini-batch.
# ---------------------------------------------------------------------------
def fused_forward_kernel(a_ref, x_ref, bsc_ref, mbias_ref,
                         w_ref, wo_ref, bo_ref, o_ref, pool_sc):
    a = a_ref[...]              # [N, N]    bf16, pre-normalized diag(1/(deg+1)) @ (A+I)
    mbias = mbias_ref[...]      # [G, N, 1] f32, 0 for member nodes, -1e30 otherwise
    h_bf = x_ref[...]           # [N, 128]  bf16, node feats zero-padded to 128 lanes

    for l in range(NUM_LAYERS):                       # static unroll (4 layers)
        # A_norm @ h on the MXU (f32 accumulation) -- already includes +h and /deg.
        msg = jnp.dot(a, h_bf, preferred_element_type=jnp.float32)        # [N, 128]
        # Linear_l (weights zero-padded to [128,128]); bias is pre-scaled by 1/deg.
        lin = jnp.dot(msg.astype(jnp.bfloat16), w_ref[l],
                      preferred_element_type=jnp.float32) + bsc_ref[l]    # [N, 128]
        h = jnp.tanh(lin)                                                 # [N, 128] f32
        # Vectorized per-graph masked max pool (additive mask; |h| <= 1 via tanh,
        # so -1e30 always dominates for non-member nodes).
        pooled = jnp.max(h[None, :, :] + mbias, axis=1)                   # [G, 128]
        # Lane slice of the [G, 4*128] scratch -> single K=512 output matmul later.
        pool_sc[:, l * FEAT_PAD:(l + 1) * FEAT_PAD] = pooled
        h_bf = h.astype(jnp.bfloat16)

    # Feature-axis concat + output linear folded into ONE [G,512]x[512,128] dot.
    out = jnp.dot(pool_sc[...].astype(jnp.bfloat16), wo_ref[...],
                  preferred_element_type=jnp.float32) + bo_ref[...]       # [G, 128]
    # relu(relu(x)) == relu(x)
    o_ref[...] = jnp.maximum(out, 0.0)


# ---------------------------------------------------------------------------
# Parameter packing: lane-dense padding, per-layer stacking, W_out pre-folded
# into per-layer 128-wide row blocks (so the in-kernel concat is just lane
# placement and the output linear is a single K=4*128 contraction).
# ---------------------------------------------------------------------------
def pack_params(params):
    in_dims = (NUM_NODE_FEATS,) + LATENT_DIM[:-1]
    w_stack = jnp.zeros((NUM_LAYERS, FEAT_PAD, FEAT_PAD), jnp.float32)
    b_stack = jnp.zeros((NUM_LAYERS, 1, FEAT_PAD), jnp.float32)
    wo_flat = jnp.zeros((NUM_LAYERS * FEAT_PAD, OUT_PAD), jnp.float32)
    off = 0
    for l, (w, b) in enumerate(params["conv"]):
        d_in, d_out = in_dims[l], LATENT_DIM[l]
        w_stack = w_stack.at[l, :d_in, :d_out].set(w)
        b_stack = b_stack.at[l, 0, :d_out].set(b[0])
        wo_flat = wo_flat.at[l * FEAT_PAD:l * FEAT_PAD + d_out, :OUTPUT_DIM].set(
            params["out_w"][off:off + d_out, :])
        off += d_out
    bo = jnp.zeros((1, OUT_PAD), jnp.float32).at[0, :OUTPUT_DIM].set(
        params["out_b"][0])
    return {
        "w": w_stack.astype(jnp.bfloat16),    # MXU operands in bf16
        "b": b_stack,                         # unscaled bias (f32); scaled per call
        "wo": wo_flat.astype(jnp.bfloat16),   # [4*128, 128]
        "bo": bo,                             # [1, 128] f32
    }


# ---------------------------------------------------------------------------
# Batched forward: adj [B,N,N], node_feat [B,N,F], graph_mask [B,G,N]
# ---------------------------------------------------------------------------
@jax.jit
def maxpool_forward(adj, node_feat, graph_mask, packed):
    b_sz, n, _ = adj.shape
    g = graph_mask.shape[1]

    # Pre-normalize adjacency: A_norm = diag(1/(deg+1)) @ (A + I); scale biases.
    inv_deg = 1.0 / (jnp.sum(adj, axis=2, keepdims=True) + 1.0)         # [B, N, 1]
    a_norm = ((adj + jnp.eye(n, dtype=adj.dtype)) * inv_deg).astype(jnp.bfloat16)
    b_scaled = packed["b"][None] * inv_deg[:, None]                     # [B, L, N, 128]

    # Zero-pad node features to 128 lanes.
    x_pad = jnp.zeros((b_sz, n, FEAT_PAD), jnp.float32)
    x_pad = x_pad.at[:, :, :node_feat.shape[2]].set(node_feat).astype(jnp.bfloat16)

    # Additive pooling mask: 0 for member nodes, -1e30 otherwise.
    # (Assumes every graph has >= 1 node; an empty graph would pool to -1e30.)
    mbias = ((graph_mask - 1.0) * 1e30)[:, :, :, None]                  # [B, G, N, 1]

    out_pad = pl.pallas_call(
        fused_forward_kernel,
        out_shape=jax.ShapeDtypeStruct((b_sz, g, OUT_PAD), jnp.float32),
        grid=(b_sz,),
        in_specs=[
            # per-mini-batch data (batch-indexed, batch dim squeezed away)
            pl.BlockSpec((None, n, n), lambda b: (b, 0, 0)),
            pl.BlockSpec((None, n, FEAT_PAD), lambda b: (b, 0, 0)),
            pl.BlockSpec((None, NUM_LAYERS, n, FEAT_PAD), lambda b: (b, 0, 0, 0)),
            pl.BlockSpec((None, g, n, 1), lambda b: (b, 0, 0, 0)),
            # weights: constant index_map -> fetched once, resident across batches
            pl.BlockSpec((NUM_LAYERS, FEAT_PAD, FEAT_PAD), lambda b: (0, 0, 0)),
            pl.BlockSpec((NUM_LAYERS * FEAT_PAD, OUT_PAD), lambda b: (0, 0)),
            pl.BlockSpec((1, OUT_PAD), lambda b: (0, 0)),
        ],
        out_specs=pl.BlockSpec((None, g, OUT_PAD), lambda b: (b, 0, 0)),
        scratch_shapes=[pltpu.VMEM((g, NUM_LAYERS * FEAT_PAD), jnp.float32)],
        compiler_params=pltpu.CompilerParams(
            dimension_semantics=("parallel",)),     # 2nd TC on v7x; no-op on v5e/v6e
    )(a_norm, x_pad, b_scaled, mbias, packed["w"], packed["wo"], packed["bo"])
    return out_pad[:, :, :OUTPUT_DIM]


# ---------------------------------------------------------------------------
# Pure-JAX f32 reference (mirrors the PyTorch forward, one mini-batch)
# ---------------------------------------------------------------------------
def reference_forward(adj, node_feat, graph_mask, params):
    degs = jnp.sum(adj, axis=1, keepdims=True) + 1.0
    cur = node_feat
    cats = []
    for (w, b) in params["conv"]:
        n2npool = adj @ cur + cur
        cur = jnp.tanh((n2npool @ w + b) / degs)
        cats.append(cur)
    h_cat = jnp.concatenate(cats, axis=1)                               # [N, 97]
    masked = jnp.where(graph_mask[:, :, None] > 0, h_cat[None], -1e30)
    pooled = jnp.max(masked, axis=1)                                    # [G, 97]
    out = pooled @ params["out_w"] + params["out_b"]
    return jnp.maximum(out, 0.0)


# ---------------------------------------------------------------------------
# Parameters and example inputs
# ---------------------------------------------------------------------------
def init_params(key):
    dims = (NUM_NODE_FEATS,) + LATENT_DIM
    params = {"conv": []}
    for i in range(NUM_LAYERS):
        key, kw, kb = jax.random.split(key, 3)
        w = jax.random.normal(kw, (dims[i], dims[i + 1]), jnp.float32) * 0.1
        b = jax.random.normal(kb, (1, dims[i + 1]), jnp.float32) * 0.01
        params["conv"].append((w, b))
    total = sum(LATENT_DIM)
    key, kw, kb = jax.random.split(key, 3)
    params["out_w"] = jax.random.normal(kw, (total, OUTPUT_DIM), jnp.float32) * 0.1
    params["out_b"] = jax.random.normal(kb, (1, OUTPUT_DIM), jnp.float32) * 0.01
    return params


def make_one_batch(key):
    # Block-diagonal adjacency: NUM_GRAPHS disjoint graphs of NODES_PER_GRAPH nodes.
    key, ka, kf = jax.random.split(key, 3)
    adj = jnp.zeros((N_TOTAL, N_TOTAL), jnp.float32)
    for g in range(NUM_GRAPHS):
        kg = jax.random.fold_in(ka, g)
        blk = (jax.random.uniform(kg, (NODES_PER_GRAPH, NODES_PER_GRAPH)) < 0.4)
        blk = blk.astype(jnp.float32)
        blk = jnp.maximum(blk, blk.T)                    # symmetric
        blk = blk * (1.0 - jnp.eye(NODES_PER_GRAPH))     # no self loops
        s = g * NODES_PER_GRAPH
        adj = adj.at[s:s + NODES_PER_GRAPH, s:s + NODES_PER_GRAPH].set(blk)
    node_feat = jax.random.normal(kf, (N_TOTAL, NUM_NODE_FEATS), jnp.float32)
    mask = jnp.zeros((NUM_GRAPHS, N_TOTAL), jnp.float32)
    for g in range(NUM_GRAPHS):
        s = g * NODES_PER_GRAPH
        mask = mask.at[g, s:s + NODES_PER_GRAPH].set(1.0)
    return adj, node_feat, mask


def make_inputs(key, batch):
    adjs, feats, masks = [], [], []
    for b in range(batch):
        a, f, m = make_one_batch(jax.random.fold_in(key, b))
        adjs.append(a); feats.append(f); masks.append(m)
    return jnp.stack(adjs), jnp.stack(feats), jnp.stack(masks)


if __name__ == "__main__":
    root = jax.random.PRNGKey(0)
    kp, kx = jax.random.split(root)
    params = init_params(kp)
    packed = pack_params(params)
    adj, node_feat, graph_mask = make_inputs(kx, BATCH)

    out = maxpool_forward(adj, node_feat, graph_mask, packed)
    out = jax.block_until_ready(out)
    assert out.shape == (BATCH, NUM_GRAPHS, OUTPUT_DIM)

    # Loose tolerance: kernel feeds bf16 operands to the MXU (f32 accumulate).
    max_err = 0.0
    for b in range(BATCH):
        ref = reference_forward(adj[b], node_feat[b], graph_mask[b], params)
        max_err = max(max_err, float(jnp.max(jnp.abs(out[b] - ref))))
    assert max_err < 0.1, f"max abs err vs f32 reference: {max_err}"

    # TODO(synk): sparse n2n/e2n spmm and host-side graph bookkeeping (S2VLIB)
    # are replaced by a dense A_norm + per-graph membership mask; the
    # edge-feature branch is skipped (num_edge_feats = 0, matching the module's
    # optional path).
    print("KERNEL_OK")
</pallas_src>

<mosaic_0001>
module attributes {stable_mosaic.version = 11 : i64} {
  func.func @fused_forward_kernel(%arg0: i32, %arg1: memref<1x16x16xbf16, #tpu.memory_space<vmem>>, %arg2: memref<1x16x128xbf16, #tpu.memory_space<vmem>>, %arg3: memref<1x4x16x128xf32, #tpu.memory_space<vmem>>, %arg4: memref<1x2x16x1xf32, #tpu.memory_space<vmem>>, %arg5: memref<4x128x128xbf16, #tpu.memory_space<vmem>>, %arg6: memref<512x128xbf16, #tpu.memory_space<vmem>>, %arg7: memref<1x128xf32, #tpu.memory_space<vmem>>, %arg8: memref<1x2x128xf32, #tpu.memory_space<vmem>>, %arg9: memref<2x512xf32, #tpu.memory_space<vmem>>) attributes {dimension_semantics = [#tpu.dimension_semantics<parallel>], iteration_bounds = array<i64: 4>, scalar_prefetch = 0 : i64, scratch_operands = 1 : i64, tpu.core_type = #tpu.core_type<tc>, window_params = [{transform_indices = @transform_0, window_bounds = array<i64: 1, 16, 16>}, {transform_indices = @transform_1, window_bounds = array<i64: 1, 16, 128>}, {transform_indices = @transform_2, window_bounds = array<i64: 1, 4, 16, 128>}, {transform_indices = @transform_3, window_bounds = array<i64: 1, 2, 16, 1>}, {pipeline_mode = #tpu.pipeline_mode<synchronous>, transform_indices = @transform_4, window_bounds = array<i64: 4, 128, 128>}, {pipeline_mode = #tpu.pipeline_mode<synchronous>, transform_indices = @transform_5, window_bounds = array<i64: 512, 128>}, {pipeline_mode = #tpu.pipeline_mode<synchronous>, transform_indices = @transform_6, window_bounds = array<i64: 1, 128>}, {transform_indices = @transform_7, window_bounds = array<i64: 1, 2, 128>}]} {
    %c0 = arith.constant 0 : index
    %c0_0 = arith.constant 0 : index
    %c0_1 = arith.constant 0 : index
    %0 = vector.load %arg1[%c0, %c0_0, %c0_1] : memref<1x16x16xbf16, #tpu.memory_space<vmem>>, vector<1x16x16xbf16>
    %1 = vector.shape_cast %0 : vector<1x16x16xbf16> to vector<16x16xbf16>
    %c0_2 = arith.constant 0 : index
    %c0_3 = arith.constant 0 : index
    %c0_4 = arith.constant 0 : index
    %c0_5 = arith.constant 0 : index
    %2 = vector.load %arg4[%c0_2, %c0_3, %c0_4, %c0_5] : memref<1x2x16x1xf32, #tpu.memory_space<vmem>>, vector<1x2x16x1xf32>
    %3 = vector.shape_cast %2 : vector<1x2x16x1xf32> to vector<2x16x1xf32>
    %c0_6 = arith.constant 0 : index
    %c0_7 = arith.constant 0 : index
    %c0_8 = arith.constant 0 : index
    %4 = vector.load %arg2[%c0_6, %c0_7, %c0_8] : memref<1x16x128xbf16, #tpu.memory_space<vmem>>, vector<1x16x128xbf16>
    %5 = vector.shape_cast %4 : vector<1x16x128xbf16> to vector<16x128xbf16>
    %cst = arith.constant dense<0.000000e+00> : vector<16x128xf32>
    %6 = tpu.matmul %1, %5, %cst {dimension_numbers = #tpu.dot_dimension_numbers<[1], [0], [0], [1], [0, 0, 1, 1], [], []>} : vector<16x16xbf16>, vector<16x128xbf16>, vector<16x128xf32> -> vector<16x128xf32>
    %7 = arith.truncf %6 : vector<16x128xf32> to vector<16x128xbf16>
    %c0_9 = arith.constant 0 : index
    %c0_10 = arith.constant 0 : index
    %c0_11 = arith.constant 0 : index
    %8 = vector.load %arg5[%c0_9, %c0_10, %c0_11] : memref<4x128x128xbf16, #tpu.memory_space<vmem>>, vector<1x128x128xbf16>
    %9 = vector.shape_cast %8 : vector<1x128x128xbf16> to vector<128x128xbf16>
    %cst_12 = arith.constant dense<0.000000e+00> : vector<16x128xf32>
    %10 = tpu.matmul %7, %9, %cst_12 {dimension_numbers = #tpu.dot_dimension_numbers<[1], [0], [0], [1], [0, 0, 1, 1], [], []>} : vector<16x128xbf16>, vector<128x128xbf16>, vector<16x128xf32> -> vector<16x128xf32>
    %c0_13 = arith.constant 0 : index
    %c0_14 = arith.constant 0 : index
    %c0_15 = arith.constant 0 : index
    %c0_16 = arith.constant 0 : index
    %11 = vector.load %arg3[%c0_13, %c0_14, %c0_15, %c0_16] : memref<1x4x16x128xf32, #tpu.memory_space<vmem>>, vector<1x1x16x128xf32>
    %12 = vector.shape_cast %11 : vector<1x1x16x128xf32> to vector<16x128xf32>
    %13 = arith.addf %10, %12 : vector<16x128xf32>
    %14 = math.tanh %13 : vector<16x128xf32>
    %15 = vector.shape_cast %14 : vector<16x128xf32> to vector<1x16x128xf32>
    %16 = vector.broadcast %15 : vector<1x16x128xf32> to vector<2x16x128xf32>
    %17 = vector.broadcast %3 : vector<2x16x1xf32> to vector<2x16x128xf32>
    %18 = arith.addf %16, %17 : vector<2x16x128xf32>
    %cst_17 = arith.constant dense<0xFF800000> : vector<2x128xf32>
    %19 = vector.multi_reduction <maximumf>, %18, %cst_17 [1] : vector<2x16x128xf32> to vector<2x128xf32>
    %c0_18 = arith.constant 0 : index
    %c0_19 = arith.constant 0 : index
    %20 = vector.load %arg9[%c0_18, %c0_19] : memref<2x512xf32, #tpu.memory_space<vmem>>, vector<2x128xf32>
    tpu.vector_store %arg9[%c0_18, %c0_19], %19 {strides = array<i32>} : memref<2x512xf32, #tpu.memory_space<vmem>>, vector<2x128xf32>,
    %21 = arith.truncf %14 : vector<16x128xf32> to vector<16x128xbf16>
    %cst_20 = arith.constant dense<0.000000e+00> : vector<16x128xf32>
    %22 = tpu.matmul %1, %21, %cst_20 {dimension_numbers = #tpu.dot_dimension_numbers<[1], [0], [0], [1], [0, 0, 1, 1], [], []>} : vector<16x16xbf16>, vector<16x128xbf16>, vector<16x128xf32> -> vector<16x128xf32>
    %23 = arith.truncf %22 : vector<16x128xf32> to vector<16x128xbf16>
    %c1 = arith.constant 1 : index
    %c0_21 = arith.constant 0 : index
    %c0_22 = arith.constant 0 : index
    %24 = vector.load %arg5[%c1, %c0_21, %c0_22] : memref<4x128x128xbf16, #tpu.memory_space<vmem>>, vector<1x128x128xbf16>
    %25 = vector.shape_cast %24 : vector<1x128x128xbf16> to vector<128x128xbf16>
    %cst_23 = arith.constant dense<0.000000e+00> : vector<16x128xf32>
    %26 = tpu.matmul %23, %25, %cst_23 {dimension_numbers = #tpu.dot_dimension_numbers<[1], [0], [0], [1], [0, 0, 1, 1], [], []>} : vector<16x128xbf16>, vector<128x128xbf16>, vector<16x128xf32> -> vector<16x128xf32>
    %c0_24 = arith.constant 0 : index
    %c1_25 = arith.constant 1 : index
    %c0_26 = arith.constant 0 : index
    %c0_27 = arith.constant 0 : index
    %27 = vector.load %arg3[%c0_24, %c1_25, %c0_26, %c0_27] : memref<1x4x16x128xf32, #tpu.memory_space<vmem>>, vector<1x1x16x128xf32>
    %28 = vector.shape_cast %27 : vector<1x1x16x128xf32> to vector<16x128xf32>
    %29 = arith.addf %26, %28 : vector<16x128xf32>
    %30 = math.tanh %29 : vector<16x128xf32>
    %31 = vector.shape_cast %30 : vector<16x128xf32> to vector<1x16x128xf32>
    %32 = vector.broadcast %31 : vector<1x16x128xf32> to vector<2x16x128xf32>
    %33 = vector.broadcast %3 : vector<2x16x1xf32> to vector<2x16x128xf32>
    %34 = arith.addf %32, %33 : vector<2x16x128xf32>
    %cst_28 = arith.constant dense<0xFF800000> : vector<2x128xf32>
    %35 = vector.multi_reduction <maximumf>, %34, %cst_28 [1] : vector<2x16x128xf32> to vector<2x128xf32>
    %c0_29 = arith.constant 0 : index
    %c128 = arith.constant 128 : index
    %36 = vector.load %arg9[%c0_29, %c128] : memref<2x512xf32, #tpu.memory_space<vmem>>, vector<2x128xf32>
    tpu.vector_store %arg9[%c0_29, %c128], %35 {strides = array<i32>} : memref<2x512xf32, #tpu.memory_space<vmem>>, vector<2x128xf32>,
    %37 = arith.truncf %30 : vector<16x128xf32> to vector<16x128xbf16>
    %cst_30 = arith.constant dense<0.000000e+00> : vector<16x128xf32>
    %38 = tpu.matmul %1, %37, %cst_30 {dimension_numbers = #tpu.dot_dimension_numbers<[1], [0], [0], [1], [0, 0, 1, 1], [], []>} : vector<16x16xbf16>, vector<16x128xbf16>, vector<16x128xf32> -> vector<16x128xf32>
    %39 = arith.truncf %38 : vector<16x128xf32> to vector<16x128xbf16>
    %c2 = arith.constant 2 : index
    %c0_31 = arith.constant 0 : index
    %c0_32 = arith.constant 0 : index
    %40 = vector.load %arg5[%c2, %c0_31, %c0_32] : memref<4x128x128xbf16, #tpu.memory_space<vmem>>, vector<1x128x128xbf16>
    %41 = vector.shape_cast %40 : vector<1x128x128xbf16> to vector<128x128xbf16>
    %cst_33 = arith.constant dense<0.000000e+00> : vector<16x128xf32>
    %42 = tpu.matmul %39, %41, %cst_33 {dimension_numbers = #tpu.dot_dimension_numbers<[1], [0], [0], [1], [0, 0, 1, 1], [], []>} : vector<16x128xbf16>, vector<128x128xbf16>, vector<16x128xf32> -> vector<16x128xf32>
    %c0_34 = arith.constant 0 : index
    %c2_35 = arith.constant 2 : index
    %c0_36 = arith.constant 0 : index
    %c0_37 = arith.constant 0 : index
    %43 = vector.load %arg3[%c0_34, %c2_35, %c0_36, %c0_37] : memref<1x4x16x128xf32, #tpu.memory_space<vmem>>, vector<1x1x16x128xf32>
    %44 = vector.shape_cast %43 : vector<1x1x16x128xf32> to vector<16x128xf32>
    %45 = arith.addf %42, %44 : vector<16x128xf32>
    %46 = math.tanh %45 : vector<16x128xf32>
    %47 = vector.shape_cast %46 : vector<16x128xf32> to vector<1x16x128xf32>
    %48 = vector.broadcast %47 : vector<1x16x128xf32> to vector<2x16x128xf32>
    %49 = vector.broadcast %3 : vector<2x16x1xf32> to vector<2x16x128xf32>
    %50 = arith.addf %48, %49 : vector<2x16x128xf32>
    %cst_38 = arith.constant dense<0xFF800000> : vector<2x128xf32>
    %51 = vector.multi_reduction <maximumf>, %50, %cst_38 [1] : vector<2x16x128xf32> to vector<2x128xf32>
    %c0_39 = arith.constant 0 : index
    %c256 = arith.constant 256 : index
    %52 = vector.load %arg9[%c0_39, %c256] : memref<2x512xf32, #tpu.memory_space<vmem>>, vector<2x128xf32>
    tpu.vector_store %arg9[%c0_39, %c256], %51 {strides = array<i32>} : memref<2x512xf32, #tpu.memory_space<vmem>>, vector<2x128xf32>,
    %53 = arith.truncf %46 : vector<16x128xf32> to vector<16x128xbf16>
    %cst_40 = arith.constant dense<0.000000e+00> : vector<16x128xf32>
    %54 = tpu.matmul %1, %53, %cst_40 {dimension_numbers = #tpu.dot_dimension_numbers<[1], [0], [0], [1], [0, 0, 1, 1], [], []>} : vector<16x16xbf16>, vector<16x128xbf16>, vector<16x128xf32> -> vector<16x128xf32>
    %55 = arith.truncf %54 : vector<16x128xf32> to vector<16x128xbf16>
    %c3 = arith.constant 3 : index
    %c0_41 = arith.constant 0 : index
    %c0_42 = arith.constant 0 : index
    %56 = vector.load %arg5[%c3, %c0_41, %c0_42] : memref<4x128x128xbf16, #tpu.memory_space<vmem>>, vector<1x128x128xbf16>
    %57 = vector.shape_cast %56 : vector<1x128x128xbf16> to vector<128x128xbf16>
    %cst_43 = arith.constant dense<0.000000e+00> : vector<16x128xf32>
    %58 = tpu.matmul %55, %57, %cst_43 {dimension_numbers = #tpu.dot_dimension_numbers<[1], [0], [0], [1], [0, 0, 1, 1], [], []>} : vector<16x128xbf16>, vector<128x128xbf16>, vector<16x128xf32> -> vector<16x128xf32>
    %c0_44 = arith.constant 0 : index
    %c3_45 = arith.constant 3 : index
    %c0_46 = arith.constant 0 : index
    %c0_47 = arith.constant 0 : index
    %59 = vector.load %arg3[%c0_44, %c3_45, %c0_46, %c0_47] : memref<1x4x16x128xf32, #tpu.memory_space<vmem>>, vector<1x1x16x128xf32>
    %60 = vector.shape_cast %59 : vector<1x1x16x128xf32> to vector<16x128xf32>
    %61 = arith.addf %58, %60 : vector<16x128xf32>
    %62 = math.tanh %61 : vector<16x128xf32>
    %63 = vector.shape_cast %62 : vector<16x128xf32> to vector<1x16x128xf32>
    %64 = vector.broadcast %63 : vector<1x16x128xf32> to vector<2x16x128xf32>
    %65 = vector.broadcast %3 : vector<2x16x1xf32> to vector<2x16x128xf32>
    %66 = arith.addf %64, %65 : vector<2x16x128xf32>
    %cst_48 = arith.constant dense<0xFF800000> : vector<2x128xf32>
    %67 = vector.multi_reduction <maximumf>, %66, %cst_48 [1] : vector<2x16x128xf32> to vector<2x128xf32>
    %c0_49 = arith.constant 0 : index
    %c384 = arith.constant 384 : index
    %68 = vector.load %arg9[%c0_49, %c384] : memref<2x512xf32, #tpu.memory_space<vmem>>, vector<2x128xf32>
    tpu.vector_store %arg9[%c0_49, %c384], %67 {strides = array<i32>} : memref<2x512xf32, #tpu.memory_space<vmem>>, vector<2x128xf32>,
    %c0_50 = arith.constant 0 : index
    %c0_51 = arith.constant 0 : index
    %69 = vector.load %arg9[%c0_50, %c0_51] : memref<2x512xf32, #tpu.memory_space<vmem>>, vector<2x512xf32>
    %70 = arith.truncf %69 : vector<2x512xf32> to vector<2x512xbf16>
    %c0_52 = arith.constant 0 : index
    %c0_53 = arith.constant 0 : index
    %71 = vector.load %arg6[%c0_52, %c0_53] : memref<512x128xbf16, #tpu.memory_space<vmem>>, vector<512x128xbf16>
    %cst_54 = arith.constant dense<0.000000e+00> : vector<2x128xf32>
    %72 = tpu.matmul %70, %71, %cst_54 {dimension_numbers = #tpu.dot_dimension_numbers<[1], [0], [0], [1], [0, 0, 1, 1], [], []>} : vector<2x512xbf16>, vector<512x128xbf16>, vector<2x128xf32> -> vector<2x128xf32>
    %c0_55 = arith.constant 0 : index
    %c0_56 = arith.constant 0 : index
    %73 = vector.load %arg7[%c0_55, %c0_56] : memref<1x128xf32, #tpu.memory_space<vmem>>, vector<1x128xf32>
    %74 = vector.broadcast %73 : vector<1x128xf32> to vector<2x128xf32>
    %75 = arith.addf %72, %74 : vector<2x128xf32>
    %cst_57 = arith.constant 0.000000e+00 : f32
    %76 = vector.broadcast %cst_57 : f32 to vector<2x128xf32>
    %77 = arith.maximumf %75, %76 : vector<2x128xf32>
    %c0_58 = arith.constant 0 : index
    %c0_59 = arith.constant 0 : index
    %c0_60 = arith.constant 0 : index
    %78 = vector.load %arg8[%c0_58, %c0_59, %c0_60] : memref<1x2x128xf32, #tpu.memory_space<vmem>>, vector<1x2x128xf32>
    %79 = vector.shape_cast %78 : vector<1x2x128xf32> to vector<2x128xf32>
    %80 = vector.shape_cast %77 : vector<2x128xf32> to vector<1x2x128xf32>
    tpu.vector_store %arg8[%c0_58, %c0_59, %c0_60], %80 {strides = array<i32>} : memref<1x2x128xf32, #tpu.memory_space<vmem>>, vector<1x2x128xf32>,
    return
  }
  func.func @transform_0(%arg0: i32) -> (i32, i32, i32) {
    %c0_i32 = arith.constant 0 : i32
    %c0_i32_0 = arith.constant 0 : i32
    %c0_i32_1 = arith.constant 0 : i32
    return %arg0, %c0_i32, %c0_i32_0 : i32, i32, i32
  }
  func.func @transform_1(%arg0: i32) -> (i32, i32, i32) {
    %c0_i32 = arith.constant 0 : i32
    %c0_i32_0 = arith.constant 0 : i32
    %c0_i32_1 = arith.constant 0 : i32
    return %arg0, %c0_i32, %c0_i32_0 : i32, i32, i32
  }
  func.func @transform_2(%arg0: i32) -> (i32, i32, i32, i32) {
    %c0_i32 = arith.constant 0 : i32
    %c0_i32_0 = arith.constant 0 : i32
    %c0_i32_1 = arith.constant 0 : i32
    %c0_i32_2 = arith.constant 0 : i32
    return %arg0, %c0_i32, %c0_i32_0, %c0_i32_1 : i32, i32, i32, i32
  }
  func.func @transform_3(%arg0: i32) -> (i32, i32, i32, i32) {
    %c0_i32 = arith.constant 0 : i32
    %c0_i32_0 = arith.constant 0 : i32
    %c0_i32_1 = arith.constant 0 : i32
    %c0_i32_2 = arith.constant 0 : i32
    return %arg0, %c0_i32, %c0_i32_0, %c0_i32_1 : i32, i32, i32, i32
  }
  func.func @transform_4(%arg0: i32) -> (i32, i32, i32) {
    %c0_i32 = arith.constant 0 : i32
    %c0_i32_0 = arith.constant 0 : i32
    %c0_i32_1 = arith.constant 0 : i32
    %c0_i32_2 = arith.constant 0 : i32
    return %c0_i32, %c0_i32_0, %c0_i32_1 : i32, i32, i32
  }
  func.func @transform_5(%arg0: i32) -> (i32, i32) {
    %c0_i32 = arith.constant 0 : i32
    %c0_i32_0 = arith.constant 0 : i32
    %c0_i32_1 = arith.constant 0 : i32
    return %c0_i32, %c0_i32_0 : i32, i32
  }
  func.func @transform_6(%arg0: i32) -> (i32, i32) {
    %c0_i32 = arith.constant 0 : i32
    %c0_i32_0 = arith.constant 0 : i32
    %c0_i32_1 = arith.constant 0 : i32
    return %c0_i32, %c0_i32_0 : i32, i32
  }
  func.func @transform_7(%arg0: i32) -> (i32, i32, i32) {
    %c0_i32 = arith.constant 0 : i32
    %c0_i32_0 = arith.constant 0 : i32
    %c0_i32_1 = arith.constant 0 : i32
    return %arg0, %c0_i32, %c0_i32_0 : i32, i32, i32
  }
}

</mosaic_0001>

<bundles_post_ra>
// kernel: maxpool_forward.1
= control target key start
LH: loop header
LB: loop body
LE: loop exit
PB: predicated region body
PF: predicated region fallthrough
CT: control target
= control target key end

     0   :  { %12 = vsyncpa [#allocation4], 0  ;;  %s2661_s0 = inlined_call_operand.vmem [shape: bf16[4,16,16], index: 0, kind: input, shape index: {}]   ;;  %s2662_s1 = inlined_call_operand.vmem [shape: bf16[4,16,128], index: 1, kind: input, shape index: {}]   ;;  %s2663_s2 = inlined_call_operand.vmem [shape: f32[4,4,16,128], index: 2, kind: input, shape index: {}]   ;;  %s2664_s3 = inlined_call_operand.vmem [shape: f32[4,2,16,1], index: 3, kind: input, shape index: {}]   ;;  %s2665_s4 = inlined_call_operand.vmem [shape: bf16[4,128,128], index: 4, kind: input, shape index: {}]   ;;  %s2666_s5 = inlined_call_operand.vmem [shape: bf16[512,128], index: 5, kind: input, shape index: {}]   ;;  %s2667_s6 = inlined_call_operand.vmem [shape: f32[1,128], index: 6, kind: input, shape index: {}]   ;;  %s2668_s7 = inlined_call_operand.hbm [shape: f32[4,2,128], index: 7, kind: output, shape index: {}]  }
   0x1   :  { %14 = vsyncpa [#allocation4 + $0x1], 0  ;;  %s2228_s24 = smov 0   ;;  %s2230_s25 = smov 0  }
   0x2   :  { %s2232_s26 = smov 0   ;;  %s2234_s27 = smov 0  }
   0x3 LB: > { %s2249_s28 = sadd.s32 4294967295, %s2181_s27   ;;  %s1653_s29 = sadd.s32 4294967294, %s2181_s27   ;;  %s2181_s27 = sphi %s2234_s27, %s2674_s27   ;;  %s2177_s26 = sphi %s2232_s26, %s2673_s26   ;;  %s2173_s25 = sphi %s2230_s25, %s2672_s25   ;;  %s2169_s24 = sphi %s2228_s24, %s2671_s24  }
   0x4   : > { %s2253_s30 = sadd.s32 1, %s2181_s27   ;;  %s194_s8 = sadd.s32 1, %s2177_s26 }
   0x5   : > { %s191_s9 = ssub.s32 %s2181_s27, %s2253_s30  ;;  %p204_p0 = scmp.ne.s32.totalorder %s2177_s26, %s2173_s25 }
   0x6   : > { %p192_p1 = scmp.eq.s32.totalorder %s191_s9, 0  ;;  %p205_p2 = scmp.eq.s32.totalorder %s2249_s28, 3 }
   0x7   : > { %p210_p3 = scmp.ne.s32.totalorder %s2173_s25, %s2169_s24  ;;  %p211_p4 = scmp.eq.s32.totalorder %s1653_s29, 3 }
   0x8   : > { %s2264_s10 = scalar_select %p192_p1, %s2177_s26, %s194_s8  }
   0x9   : > { %p2266_p5 = por %p205_p2, %p204_p0  ;;  %p2270_p6 = por %p211_p4, %p210_p3 }
   0xa   : > { %p1656_p7 = scmp.ge.s32.totalorder %s2181_s27, 1  ;;  %p270_p8 = scmp.lt.s32.totalorder %s2181_s27, 5 }
   0xc   : > { %p271_p9 = pnand %p1656_p7, %p270_p8 }
   0xd   : > { %p317_p10 = scmp.lt.s32.totalorder (!%p271_p9), %s2249_s28, 3  ;;  %v2183_v0 = vmov (!%p271_p9), 0.0   ;;  %vm2184_vm0 = vmmov (!%p271_p9), 0   ;;  %vm357_vm1 = vcmask (!%p271_p9), 130048   ;;  %v2038_v3 = vld [vmem:[%s2665_s4] sm:$0xff] (!%p271_p9)   ;;  %v2039_v4 = vld [vmem:[%s2665_s4 + $0x8] sm:$0xff] (!%p271_p9)   ;;  %v555_v45 = vlaneseq (!%p271_p9) }
   0xe   : > { %274 = sbr.rel (%p271_p9) target bundleno = 2090 (0x82a), region = 48  ;;  %1887 = vmatprep.subr.bf16.mxu1 (!%p271_p9), %v2183_v0  ;;  %1889 = vmatprep.mubr.msk.bf16.mxu1 (!%p271_p9), %vm2184_vm0, %v2183_v0  ;;  %v2040_v5 = vld [vmem:[%s2665_s4 + $0x10] sm:$0xff] (!%p271_p9)   ;;  %v2041_v6 = vld [vmem:[%s2665_s4 + $0x18] sm:$0xff] (!%p271_p9)   ;;  %v2042_v7 = vld [vmem:[%s2665_s4 + $0x20] sm:$0xff] (!%p271_p9)   ;;  %v2185_v11 = vmov (!%p271_p9), 0   ;;  %vm571_vm2 = vcmask (!%p271_p9), 1041409  }
   0xf   : > { %1913 = vmatprep.subr.bf16.mxu0 (!%p271_p9), %v2183_v0  ;;  %1915 = vmatprep.mubr.msk.bf16.mxu0 (!%p271_p9), %vm2184_vm0, %v2183_v0  ;;  %v2043_v8 = vld [vmem:[%s2665_s4 + $0x28] sm:$0xff] (!%p271_p9)   ;;  %v2044_v9 = vld [vmem:[%s2665_s4 + $0x30] sm:$0xff] (!%p271_p9)   ;;  %v2045_v10 = vld [vmem:[%s2665_s4 + $0x38] sm:$0xff] (!%p271_p9)   ;;  %v2186_v43 = vmov (!%p271_p9), 1983009808   ;;  %v556_v52 = vshrl.u32 (!%p271_p9), %v555_v45, 7 }
  0x10   : > { %2035 = vset.pattern.permute.xlu1 (!%p271_p9), %v2185_v11  ;;  %2034 = vset.pattern.permute.xlu0 (!%p271_p9), %v2185_v11  ;;  %v2046_v42 = vld [vmem:[%s2665_s4 + $0x40] sm:$0xff] (!%p271_p9)   ;;  %v553_v44 = vunpack.c.l.s4 (!%p271_p9), %v2186_v43  ;;  %v2047_v50 = vld [vmem:[%s2665_s4 + $0x48] sm:$0xff] (!%p271_p9)   ;;  %v2048_v57 = vld [vmem:[%s2665_s4 + $0x50] sm:$0xff] (!%p271_p9)   ;;  %vm573_vm3 = vcmask (!%p271_p9), 1043459   ;;  %vm575_vm4 = vcmask (!%p271_p9), 1045509   ;;  %vm577_vm5 = vcmask (!%p271_p9), 1047559  }
  0x11   : > { %v2049_v63 = vld [vmem:[%s2665_s4 + $0x58] sm:$0xff] (!%p271_p9)   ;;  %v2052_v11 = vld [vmem:[%s2665_s4 + $0x70] sm:$0xff] (!%p271_p9)   ;;  %s1792_s16 = sshll.u32 (!%p271_p9), %s2249_s28, 5 }
  0x12   : > { %v554_v51 = vunpack.c.0.s8 (!%p271_p9), %v553_v44  ;;  %v2055_v44 = vld [vmem:[%s2665_s4 + $0x88] sm:$0xff] (!%p271_p9)   ;;  %s2619_s21 = scalar_lea.hbm (!%p271_p9), %s2668_s7, %s1792_s16 }
  0x14   : > { %v2374_v58 = vsub.s32 (!%p271_p9), %v554_v51, %v556_v52 }
  0x15   : > { %s2281_s13 = scalar_select %p317_p10, %s2249_s28, 3 }
  0x16   : > { %s2187_s28 = smov [#allocation3]  }
  0x17   : > { %s1795_s14 = sshll.u32 %s2281_s13, 3  ;;  %s1798_s29 = sshll.u32 %s2281_s13, 5 }
  0x18   : > { %s321_s17 = scalar_lea.vmem %s2661_s0, %s1795_s14  ;;  %s326_s20 = scalar_lea.vmem %s2662_s1, %s1795_s14 }
  0x19   : > { %v2036_v1 = vld [vmem:[%s326_s20] sm:$0xff]   ;;  %s336_s14 = scalar_lea.vmem %s2664_s3, %s1798_s29  ;;  %s1797_s15 = sshll.u32 %s2281_s13, 6 }
  0x1a   : > { %v2293_v2 = vld [vmem:[%s321_s17] sm:$0xff]   ;;  %1888 = vmatpush3.bf16.msra.mxu1 %v2036_v1  ;;  %v342_v12 = vld [vmem:[%s336_s14 + $0x10] sm:$0xff]  ;;  %v343_v14 = vld [vmem:[%s336_s14 + $0x18] sm:$0xff]  ;;  %s2342_s18 = scalar_lea.vmem %s2663_s2, %s1797_s15  ;;  %s2123_s29 = sshll.u32 %s2187_s28, 4  ;;  %s2124_s29 = int_to_ptr.vmem [resolvable:$false] %s2123_s29 }
  0x1b   : > { %1893 = vmatprep.subr.bf16.mxu1 %v2183_v0  ;;  %v340_v13 = vld [vmem:[%s336_s14] sm:$0xff]  ;;  %524 = vperm.xlu0 %2034, %v342_v12   ;;  %v341_v15 = vld [vmem:[%s336_s14 + $0x8] sm:$0xff]  ;;  %v2053_v12 = vld [vmem:[%s2665_s4 + $0x78] sm:$0xff]   ;;  %s2125_s8 = scalar_lea.vmem %s2124_s29, 64 }
  0x1c   : > { %514 = vperm.xlu1 %2035, %v340_v13   ;;  %v419_v21 = vld [vmem:[%s2342_s18] sm:$0xff]  ;;  %v420_v23 = vld [vmem:[%s2342_s18 + $0x8] sm:$0xff] }
  0x1d   : > { %1890 = vmatmul.mubr.msk.bf16.vlgmr.msra.gmra.mrb[0].mxu1 %vm357_vm1, %v2293_v2 }
  0x1e   : > { %1894 = vmatpush3.bf16.msra.mxu1 %v2038_v3  ;;  %1909 = vmatprep.mubr.msk.bf16.mxu1 %vm2184_vm0, %v2183_v0 }
  0x1f   : > { %1895 = vmatprep.subr.bf16.mxu1 %v2183_v0  ;;  %529 = vperm.xlu0 %2034, %v343_v14  }
  0x20   : > { %519 = vperm.xlu1 %2035, %v341_v15  }
  0x22   : > { %1896 = vmatpush3.bf16.msra.mxu1 %v2039_v4 }
  0x23   : > { %1897 = vmatprep.subr.bf16.mxu1 %v2183_v0 }
  0x26   : > { %1898 = vmatpush3.bf16.msra.mxu1 %v2040_v5  ;;  %v2050_v5 = vld [vmem:[%s2665_s4 + $0x60] sm:$0xff]  }
  0x27   : > { %1899 = vmatprep.subr.bf16.mxu1 %v2183_v0 }
  0x2a   : > { %1900 = vmatpush3.bf16.msra.mxu1 %v2041_v6 }
  0x2b   : > { %1901 = vmatprep.subr.bf16.mxu1 %v2183_v0 }
  0x2e   : > { %1902 = vmatpush3.bf16.msra.mxu1 %v2042_v7 }
  0x2f   : > { %1903 = vmatprep.subr.bf16.mxu1 %v2183_v0 }
  0x32   : > { %1904 = vmatpush3.bf16.msra.mxu1 %v2043_v8 }
  0x33   : > { %1905 = vmatprep.subr.bf16.mxu1 %v2183_v0 }
  0x36   : > { %1906 = vmatpush3.bf16.msra.mxu1 %v2044_v9  ;;  %v2051_v9 = vld [vmem:[%s2665_s4 + $0x68] sm:$0xff]  }
  0x37   : > { %1907 = vmatprep.subr.bf16.mxu1 %v2183_v0 }
  0x3a   : > { %1908 = vmatpush3.bf16.msra.mxu1 %v2045_v10 }
  0x3b   : > { %1939 = vmatprep.subr.bf16.mxu1 %v2183_v0 }
  0x9a   : > { %v2346_v29 = vpop.permute.xlu0 %524 }
  0x9b   : > { %v2348_v30 = vpop.permute.xlu1 %514 }
  0x9e   : > { %v2350_v32 = vpop.permute.xlu0 %529 }
  0x9f   : > { %v2352_v33 = vpop.permute.xlu1 %519 }
  0xf0   : > { %v395_v16 = vpop.f32.mrb[0].mxu1 }
  0xf1   : > { %v1891_v17 = vpop.f32.mrb[1].mxu1 }
  0xf2   : > { %v398_v18 = vpop.f32.mrb[2].mxu1 }
  0xf3   : > { %v402_v19 = vpack.c.bf16 %v398_v18, %v395_v16  ;;  %v1892_v20 = vpop.f32.mrb[3].mxu1  ;;  %v1694_v18 = vld [vmem:[%s2342_s18 + $0x10] sm:$0xff] }
  0xf4   : > { %v1695_v20 = vld [vmem:[%s2342_s18 + $0x18] sm:$0xff] }
  0xf5   : > { %1910 = vmatmul.mubr.bf16.vlgmr.msra.gmra.mrb[4].mxu1 %v402_v19 }
  0xf6   : > { %1941 = vmatprep.mubr.msk.bf16.mxu1 %vm2184_vm0, %v2183_v0 }
 0x1c8   : > { %v503_v22 = vpop.f32.mrb[4].mxu1 }
 0x1c9   : > { %v504_v24 = vadd.f32 %v503_v22, %v419_v21  ;;  %v1911_v25 = vpop.f32.mrb[5].mxu1 }
 0x1ca   : > { %v506_v26 = vpop.f32.mrb[6].mxu1 }
 0x1cb   : > { %2103 = vtanh.f32 %v504_v24  ;;  %v507_v27 = vadd.f32 %v506_v26, %v420_v23  ;;  %v1912_v28 = vpop.f32.mrb[7].mxu1 }
 0x1cd   : > { %2105 = vtanh.f32 %v507_v27 }
 0x1d5   : > { %v2104_v31 = vpop.eup %2103 }
 0x1d6   : > { %v534_v35 = vadd.f32 %v2104_v31, %v2346_v29  ;;  %v532_v36 = vadd.f32 %v2104_v31, %v2348_v30 }
 0x1d7   : > { %v2106_v34 = vpop.eup %2105 }
 0x1d8   : > { %v535_v37 = vadd.f32 %v2106_v34, %v2350_v32  ;;  %v533_v38 = vadd.f32 %v2106_v34, %v2352_v33  ;;  %v581_v39 = vpack.c.bf16 %v2106_v34, %v2104_v31 }
 0x1da   : > { %v543_v40 = vmax.f32 %v534_v35, %v535_v37  ;;  %v536_v41 = vmax.f32 %v532_v36, %v533_v38  ;;  %1914 = vmatpush3.bf16.msra.mxu0 %v581_v39  ;;  %v2054_v39 = vld [vmem:[%s2665_s4 + $0x80] sm:$0xff]  }
 0x1db   : > { %1919 = vmatprep.subr.bf16.mxu0 %v2183_v0 }
 0x1dc   : > { %v544_v46 = vrot.slane %v543_v40, 4  ;;  %v537_v47 = vrot.slane %v536_v41, 4 }
 0x1dd   : > { %1916 = vmatmul.mubr.msk.bf16.vlgmr.msra.gmra.mrb[0].mxu0 %vm357_vm1, %v2293_v2 }
 0x1de   : > { %v545_v48 = vmax.f32 %v543_v40, %v544_v46  ;;  %v538_v49 = vmax.f32 %v536_v41, %v537_v47  ;;  %1920 = vmatpush3.bf16.msra.mxu0 %v2046_v42  ;;  %1935 = vmatprep.mubr.msk.bf16.mxu0 %vm2184_vm0, %v2183_v0 }
 0x1df   : > { %1921 = vmatprep.subr.bf16.mxu0 %v2183_v0 }
 0x1e0   : > { %v546_v53 = vrot.slane %v545_v48, 2  ;;  %v539_v54 = vrot.slane %v538_v49, 2 }
 0x1e2   : > { %v547_v55 = vmax.f32 %v545_v48, %v546_v53  ;;  %v540_v56 = vmax.f32 %v538_v49, %v539_v54  ;;  %1922 = vmatpush3.bf16.msra.mxu0 %v2047_v50  ;;  %v2056_v49 = vld [vmem:[%s2665_s4 + $0x90] sm:$0xff]   ;;  %v2057_v54 = vld [vmem:[%s2665_s4 + $0x98] sm:$0xff]  }
 0x1e3   : > { %1923 = vmatprep.subr.bf16.mxu0 %v2183_v0 }
 0x1e4   : > { %v548_v59 = vrot.slane %v547_v55, 1  ;;  %v541_v60 = vrot.slane %v540_v56, 1 }
 0x1e6   : > { %v549_v61 = vmax.f32 %v547_v55, %v548_v59  ;;  %v542_v62 = vmax.f32 %v540_v56, %v541_v60  ;;  %1924 = vmatpush3.bf16.msra.mxu0 %v2048_v57  ;;  %v2058_v59 = vld [vmem:[%s2665_s4 + $0xa0] sm:$0xff]  }
 0x1e7   : > { %1925 = vmatprep.subr.bf16.mxu0 %v2183_v0 }
 0x1e8   : > { %v565_v1 = vrot.slane %v549_v61, %v2374_v58  ;;  %v558_v4 = vrot.slane %v542_v62, %v2374_v58  ;;  %v2059_v62 = vld [vmem:[%s2665_s4 + $0xa8] sm:$0xff]  }
 0x1ea   : > { %v570_v3 = vrot.slane %v565_v1, 7  ;;  %1926 = vmatpush3.bf16.msra.mxu0 %v2049_v63 }
 0x1eb   : > { %1927 = vmatprep.subr.bf16.mxu0 %v2183_v0 }
 0x1ec   : > { %v572_v6 = vsel %vm571_vm2, %v570_v3, %v558_v4  ;;  %v2061_v4 = vld [vmem:[%s2665_s4 + $0xb8] sm:$0xff]  }
 0x1ed   : > { %v574_v7 = vsel %vm573_vm3, %v570_v3, %v572_v6 }
 0x1ee   : > { %v576_v8 = vsel %vm575_vm4, %v570_v3, %v574_v7  ;;  %1928 = vmatpush3.bf16.msra.mxu0 %v2050_v5 }
 0x1ef   : > { %v578_v10 = vsel %vm577_vm5, %v570_v3, %v576_v8  ;;  %1929 = vmatprep.subr.bf16.mxu0 %v2183_v0  ;;  %v2060_v3 = vld [vmem:[%s2665_s4 + $0xb0] sm:$0xff]  }
 0x1f0   : > { %580 = vst [vmem:[#allocation2] sm:$0x3] %v578_v10  ;;  %v1721_v10 = vld [vmem:[%s2342_s18 + $0x20] sm:$0xff] }
 0x1f2   : > { %1930 = vmatpush3.bf16.msra.mxu0 %v2051_v9 }
 0x1f3   : > { %1931 = vmatprep.subr.bf16.mxu0 %v2183_v0 }
 0x1f6   : > { %1932 = vmatpush3.bf16.msra.mxu0 %v2052_v11 }
 0x1f7   : > { %1933 = vmatprep.subr.bf16.mxu0 %v2183_v0 }
 0x1fa   : > { %1934 = vmatpush3.bf16.msra.mxu0 %v2053_v12  ;;  %v1722_v12 = vld [vmem:[%s2342_s18 + $0x28] sm:$0xff] }
 0x1fb   : > { %1965 = vmatprep.subr.bf16.mxu0 %v2183_v0 }
 0x2b0   : > { %v616_v13 = vpop.f32.mrb[0].mxu0 }
 0x2b1   : > { %v1917_v14 = vpop.f32.mrb[1].mxu0 }
 0x2b2   : > { %v619_v15 = vpop.f32.mrb[2].mxu0 }
 0x2b3   : > { %v623_v16 = vpack.c.bf16 %v619_v15, %v616_v13  ;;  %v1918_v17 = vpop.f32.mrb[3].mxu0 }
 0x2b5   : > { %1936 = vmatmul.mubr.bf16.vlgmr.msra.gmra.mrb[4].mxu0 %v623_v16 }
 0x2b6   : > { %1967 = vmatprep.mubr.msk.bf16.mxu0 %vm2184_vm0, %v2183_v0 }
 0x388   : > { %v726_v19 = vpop.f32.mrb[4].mxu0 }
 0x389   : > { %v727_v21 = vadd.f32 %v1694_v18, %v726_v19  ;;  %v1937_v22 = vpop.f32.mrb[5].mxu0 }
 0x38a   : > { %v729_v23 = vpop.f32.mrb[6].mxu0 }
 0x38b   : > { %2107 = vtanh.f32 %v727_v21  ;;  %v730_v24 = vadd.f32 %v1695_v20, %v729_v23  ;;  %v1938_v25 = vpop.f32.mrb[7].mxu0 }
 0x38d   : > { %2109 = vtanh.f32 %v730_v24 }
 0x395   : > { %v2108_v26 = vpop.eup %2107 }
 0x396   : > { %v735_v28 = vadd.f32 %v2108_v26, %v2348_v30  ;;  %v737_v31 = vadd.f32 %v2108_v26, %v2346_v29 }
 0x397   : > { %v2110_v27 = vpop.eup %2109 }
 0x398   : > { %v736_v34 = vadd.f32 %v2110_v27, %v2352_v33  ;;  %v738_v35 = vadd.f32 %v2110_v27, %v2350_v32  ;;  %v778_v36 = vpack.c.bf16 %v2110_v27, %v2108_v26  ;;  %v2062_v27 = vld [vmem:[%s2665_s4 + $0xc0] sm:$0xff]  }
 0x39a   : > { %v739_v37 = vmax.f32 %v735_v28, %v736_v34  ;;  %v746_v38 = vmax.f32 %v737_v31, %v738_v35  ;;  %1940 = vmatpush3.bf16.msra.mxu1 %v778_v36  ;;  %v2063_v36 = vld [vmem:[%s2665_s4 + $0xc8] sm:$0xff]  }
 0x39b   : > { %1945 = vmatprep.subr.bf16.mxu1 %v2183_v0 }
 0x39c   : > { %v740_v40 = vrot.slane %v739_v37, 4  ;;  %v747_v41 = vrot.slane %v746_v38, 4 }
 0x39d   : > { %1942 = vmatmul.mubr.msk.bf16.vlgmr.msra.gmra.mrb[8].mxu1 %vm357_vm1, %v2293_v2 }
 0x39e   : > { %v741_v42 = vmax.f32 %v739_v37, %v740_v40  ;;  %v748_v43 = vmax.f32 %v746_v38, %v747_v41  ;;  %1946 = vmatpush3.bf16.msra.mxu1 %v2054_v39  ;;  %1961 = vmatprep.mubr.msk.bf16.mxu1 %vm2184_vm0, %v2183_v0 }
 0x39f   : > { %1947 = vmatprep.subr.bf16.mxu1 %v2183_v0 }
 0x3a0   : > { %v742_v45 = vrot.slane %v741_v42, 2  ;;  %v749_v46 = vrot.slane %v748_v43, 2 }
 0x3a2   : > { %v743_v47 = vmax.f32 %v741_v42, %v742_v45  ;;  %v750_v48 = vmax.f32 %v748_v43, %v749_v46  ;;  %1948 = vmatpush3.bf16.msra.mxu1 %v2055_v44  ;;  %v2065_v45 = vld [vmem:[%s2665_s4 + $0xd8] sm:$0xff]  }
 0x3a3   : > { %1949 = vmatprep.subr.bf16.mxu1 %v2183_v0 }
 0x3a4   : > { %v744_v50 = vrot.slane %v743_v47, 1  ;;  %v751_v51 = vrot.slane %v750_v48, 1 }
 0x3a6   : > { %v745_v52 = vmax.f32 %v743_v47, %v744_v50  ;;  %v752_v53 = vmax.f32 %v750_v48, %v751_v51  ;;  %1950 = vmatpush3.bf16.msra.mxu1 %v2056_v49  ;;  %v2066_v49 = vld [vmem:[%s2665_s4 + $0xe0] sm:$0xff]  }
 0x3a7   : > { %1951 = vmatprep.subr.bf16.mxu1 %v2183_v0 }
 0x3a8   : > { %v768_v55 = vrot.slane %v752_v53, %v2374_v58  ;;  %v761_v56 = vrot.slane %v745_v52, %v2374_v58  ;;  %v2067_v52 = vld [vmem:[%s2665_s4 + $0xe8] sm:$0xff]  }
 0x3aa   : > { %v771_v57 = vrot.slane %v768_v55, 7  ;;  %1952 = vmatpush3.bf16.msra.mxu1 %v2057_v54  ;;  %v2068_v55 = vld [vmem:[%s2665_s4 + $0xf0] sm:$0xff]  }
 0x3ab   : > { %1953 = vmatprep.subr.bf16.mxu1 %v2183_v0 }
 0x3ac   : > { %v772_v60 = vsel %vm571_vm2, %v771_v57, %v761_v56  ;;  %v2069_v56 = vld [vmem:[%s2665_s4 + $0xf8] sm:$0xff]  }
 0x3ad   : > { %v773_v61 = vsel %vm573_vm3, %v771_v57, %v772_v60 }
 0x3ae   : > { %1954 = vmatpush3.bf16.msra.mxu1 %v2058_v59  ;;  %v774_v63 = vsel %vm575_vm4, %v771_v57, %v773_v61 }
 0x3af   : > { %1955 = vmatprep.subr.bf16.mxu1 %v2183_v0  ;;  %v775_v1 = vsel %vm577_vm5, %v771_v57, %v774_v63  ;;  %v2070_v63 = vld [vmem:[%s2666_s5 + $0x40] sm:$0xff]  }
 0x3b0   : > { %777 = vst [vmem:[#allocation2 + $0x2] sm:$0x3] %v775_v1  ;;  %v2071_v1 = vld [vmem:[%s2666_s5] sm:$0xff]  }
 0x3b2   : > { %1956 = vmatpush3.bf16.msra.mxu1 %v2059_v62 }
 0x3b3   : > { %1957 = vmatprep.subr.bf16.mxu1 %v2183_v0 }
 0x3b6   : > { %1958 = vmatpush3.bf16.msra.mxu1 %v2060_v3  ;;  %v2073_v3 = vld [vmem:[%s2666_s5 + $0x80] sm:$0xff]  }
 0x3b7   : > { %1959 = vmatprep.subr.bf16.mxu1 %v2183_v0 }
 0x3ba   : > { %1960 = vmatpush3.bf16.msra.mxu1 %v2061_v4  ;;  %v2074_v4 = vld [vmem:[%s2666_s5 + $0x48] sm:$0xff]  }
 0x3bb   : > { %1843 = vmatprep.subr.bf16.mxu1 %v2070_v63 }
 0x470   : > { %v813_v5 = vpop.f32.mrb[8].mxu1 }
 0x471   : > { %v1943_v6 = vpop.f32.mrb[9].mxu1 }
 0x472   : > { %v816_v7 = vpop.f32.mrb[10].mxu1  ;;  %v2076_v6 = vld [vmem:[%s2666_s5 + $0xc8] sm:$0xff]  }
 0x473   : > { %v820_v8 = vpack.c.bf16 %v816_v7, %v813_v5  ;;  %v1944_v9 = vpop.f32.mrb[11].mxu1  ;;  %v2075_v5 = vld [vmem:[%s2666_s5 + $0x8] sm:$0xff]  }
 0x474   : > { %v2077_v7 = vld [vmem:[%s2666_s5 + $0x88] sm:$0xff]   ;;  %v2079_v9 = vld [vmem:[%s2666_s5 + $0x10] sm:$0xff]  }
 0x475   : > { %1962 = vmatmul.mubr.bf16.vlgmr.msra.gmra.mrb[12].mxu1 %v820_v8  ;;  %v2078_v8 = vld [vmem:[%s2666_s5 + $0x50] sm:$0xff]  }
 0x476   : > { %1844 = vmatpush3.bf16.msra.mxu1 %v2071_v1 }
 0x477   : > { %1845 = vmatprep.subr.bf16.mxu1 %v2074_v4 }
 0x47a   : > { %1846 = vmatpush3.bf16.msra.mxu1 %v2075_v5 }
 0x47b   : > { %1847 = vmatprep.subr.bf16.mxu1 %v2078_v8 }
 0x47e   : > { %1848 = vmatpush3.bf16.msra.mxu1 %v2079_v9 }
 0x548   : > { %v923_v11 = vpop.f32.mrb[12].mxu1 }
 0x549   : > { %v924_v13 = vadd.f32 %v1721_v10, %v923_v11  ;;  %v1963_v14 = vpop.f32.mrb[13].mxu1  ;;  %v2080_v10 = vld [vmem:[%s2666_s5 + $0xd0] sm:$0xff]  }
 0x54a   : > { %v926_v15 = vpop.f32.mrb[14].mxu1  ;;  %v2081_v11 = vld [vmem:[%s2666_s5 + $0x90] sm:$0xff]   ;;  %v2084_v14 = vld [vmem:[%s2666_s5 + $0xd8] sm:$0xff]  }
 0x54b   : > { %2111 = vtanh.f32 %v924_v13  ;;  %v927_v16 = vadd.f32 %v1722_v12, %v926_v15  ;;  %v1964_v17 = vpop.f32.mrb[15].mxu1  ;;  %v2082_v12 = vld [vmem:[%s2666_s5 + $0x58] sm:$0xff]  }
 0x54c   : > { %v2083_v13 = vld [vmem:[%s2666_s5 + $0x18] sm:$0xff]   ;;  %1849 = vmatprep.subr.bf16.mxu1 %v2082_v12  ;;  %v2087_v17 = vld [vmem:[%s2666_s5 + $0x20] sm:$0xff]  }
 0x54d   : > { %2113 = vtanh.f32 %v927_v16  ;;  %1850 = vmatpush3.bf16.msra.mxu1 %v2083_v13  ;;  %v2085_v15 = vld [vmem:[%s2666_s5 + $0x98] sm:$0xff]   ;;  %v2086_v16 = vld [vmem:[%s2666_s5 + $0x60] sm:$0xff]  }
 0x54e   : > { %1851 = vmatprep.subr.bf16.mxu1 %v2086_v16 }
 0x551   : > { %1852 = vmatpush3.bf16.msra.mxu1 %v2087_v17 }
 0x555   : > { %v2112_v18 = vpop.eup %2111 }
 0x556   : > { %v932_v20 = vadd.f32 %v2112_v18, %v2348_v30  ;;  %v934_v21 = vadd.f32 %v2112_v18, %v2346_v29 }
 0x557   : > { %v2114_v19 = vpop.eup %2113 }
 0x558   : > { %v933_v22 = vadd.f32 %v2114_v19, %v2352_v33  ;;  %v935_v23 = vadd.f32 %v2114_v19, %v2350_v32  ;;  %v975_v24 = vpack.c.bf16 %v2114_v19, %v2112_v18  ;;  %v2088_v18 = vld [vmem:[%s2666_s5 + $0xe0] sm:$0xff]  }
 0x559   : > { %v2089_v19 = vld [vmem:[%s2666_s5 + $0xa0] sm:$0xff]  }
 0x55a   : > { %v936_v25 = vmax.f32 %v932_v20, %v933_v22  ;;  %v943_v26 = vmax.f32 %v934_v21, %v935_v23  ;;  %1966 = vmatpush3.bf16.msra.mxu0 %v975_v24  ;;  %v2090_v20 = vld [vmem:[%s2666_s5 + $0x68] sm:$0xff]   ;;  %v2094_v23 = vld [vmem:[%s2666_s5 + $0x70] sm:$0xff]  }
 0x55b   : > { %1971 = vmatprep.subr.bf16.mxu0 %v2183_v0  ;;  %v2091_v21 = vld [vmem:[%s2666_s5 + $0x28] sm:$0xff]   ;;  %1853 = vmatprep.subr.bf16.mxu1 %v2090_v20 }
 0x55c   : > { %v937_v28 = vrot.slane %v936_v25, 4  ;;  %v944_v31 = vrot.slane %v943_v26, 4  ;;  %v2092_v22 = vld [vmem:[%s2666_s5 + $0xe8] sm:$0xff]   ;;  %1854 = vmatpush3.bf16.msra.mxu1 %v2091_v21 }
 0x55d   : > { %1968 = vmatmul.mubr.msk.bf16.vlgmr.msra.gmra.mrb[8].mxu0 %vm357_vm1, %v2293_v2  ;;  %v2064_v2 = vld [vmem:[%s2665_s4 + $0xd0] sm:$0xff]   ;;  %v2093_v24 = vld [vmem:[%s2666_s5 + $0xa8] sm:$0xff]   ;;  %1855 = vmatprep.subr.bf16.mxu1 %v2094_v23 }
 0x55e   : > { %v938_v34 = vmax.f32 %v936_v25, %v937_v28  ;;  %v945_v35 = vmax.f32 %v943_v26, %v944_v31  ;;  %1972 = vmatpush3.bf16.msra.mxu0 %v2062_v27  ;;  %1987 = vmatprep.mubr.msk.bf16.mxu0 %vm2184_vm0, %v2183_v0  ;;  %v2096_v25 = vld [vmem:[%s2666_s5 + $0xf0] sm:$0xff]   ;;  %v2098_v27 = vld [vmem:[%s2666_s5 + $0x78] sm:$0xff]  }
 0x55f   : > { %1973 = vmatprep.subr.bf16.mxu0 %v2183_v0  ;;  %v2095_v26 = vld [vmem:[%s2666_s5 + $0x30] sm:$0xff]   ;;  %v2100_v31 = vld [vmem:[%s2666_s5 + $0xf8] sm:$0xff]  }
 0x560   : > { %v939_v37 = vrot.slane %v938_v34, 2  ;;  %v946_v38 = vrot.slane %v945_v35, 2  ;;  %v2097_v28 = vld [vmem:[%s2666_s5 + $0xb0] sm:$0xff]   ;;  %1856 = vmatpush3.bf16.msra.mxu1 %v2095_v26 }
 0x561   : > { %1857 = vmatprep.subr.bf16.mxu1 %v2098_v27 }
 0x562   : > { %v940_v39 = vmax.f32 %v938_v34, %v939_v37  ;;  %v947_v40 = vmax.f32 %v945_v35, %v946_v38  ;;  %1974 = vmatpush3.bf16.msra.mxu0 %v2063_v36  ;;  %v2099_v34 = vld [vmem:[%s2666_s5 + $0x38] sm:$0xff]   ;;  %v1748_v36 = vld [vmem:[%s2342_s18 + $0x30] sm:$0xff] }
 0x563   : > { %1975 = vmatprep.subr.bf16.mxu0 %v2183_v0  ;;  %v2101_v35 = vld [vmem:[%s2666_s5 + $0xb8] sm:$0xff]  }
 0x564   : > { %v941_v41 = vrot.slane %v940_v39, 1  ;;  %v948_v42 = vrot.slane %v947_v40, 1  ;;  %1858 = vmatpush3.bf16.msra.mxu1 %v2099_v34  ;;  %v1749_v38 = vld [vmem:[%s2342_s18 + $0x38] sm:$0xff]  ;;  %s314_s18 = sand.u32 1, %s2173_s25  }
 0x565   : > { %s1657_s9 = sshll.u32 %s314_s18, 1  ;;  %s1545_s22 = scalar_lea.sflag [#allocation4], %s314_s18 }
 0x566   : > { %v942_v43 = vmax.f32 %v940_v39, %v941_v41  ;;  %v949_v44 = vmax.f32 %v947_v40, %v948_v42  ;;  %1976 = vmatpush3.bf16.msra.mxu0 %v2064_v2  ;;  %s316_s17 = scalar_lea.vmem [#allocation3], %s1657_s9 }
 0x567   : > { %1977 = vmatprep.subr.bf16.mxu0 %v2183_v0  ;;  %s1558_s13 = sshll.u32 %s316_s17, 4  ;;  %s2621_s13 = int_to_ptr.vmem [resolvable:$true] %s1558_s13 }
 0x568   : > { %v965_v46 = vrot.slane %v949_v44, %v2374_v58  ;;  %v958_v47 = vrot.slane %v942_v43, %v2374_v58  ;;  %s2119_s23 = scalar_lea.vmem %s2621_s13, 32  ;;  %p2126_p0 = scmp.lt.s32.totalorder %s2621_s13, %s2124_s29 }
 0x569   : > { %p2120_p11 = scmp.ne.s32.totalorder %s2621_s13, %s2119_s23  ;;  %p2127_p1 = scmp.lt.s32.totalorder %s2125_s8, %s2119_s23 }
 0x56a   : > { %v968_v48 = vrot.slane %v965_v46, 7  ;;  %1978 = vmatpush3.bf16.msra.mxu0 %v2065_v45 }
 0x56b   : > { %1979 = vmatprep.subr.bf16.mxu0 %v2183_v0  ;;  %p2121_p12 = pnand %p2120_p11, %p2266_p5  ;;  %p2128_p2 = por %p2127_p1, %p2126_p0 }
 0x56c   : > { %v969_v50 = vsel %vm571_vm2, %v968_v48, %v958_v47 }
 0x56d   : > { %v970_v51 = vsel %vm573_vm3, %v968_v48, %v969_v50  ;;  %p2122_p13 = pneg %p2121_p12 }
 0x56e   : > { %1980 = vmatpush3.bf16.msra.mxu0 %v2066_v49  ;;  %v971_v53 = vsel %vm575_vm4, %v968_v48, %v970_v51 }
 0x56f   : > { %1981 = vmatprep.subr.bf16.mxu0 %v2183_v0  ;;  %v972_v54 = vsel %vm577_vm5, %v968_v48, %v971_v53  ;;  %p2129_p3 = pnand %p2128_p2, %p2122_p13 }
 0x570   : > { %974 = vst [vmem:[#allocation2 + $0x4] sm:$0x3] %v972_v54 }
 0x572   : > { %1982 = vmatpush3.bf16.msra.mxu0 %v2067_v52 }
 0x573   : > { %1983 = vmatprep.subr.bf16.mxu0 %v2183_v0 }
 0x576   : > { %1984 = vmatpush3.bf16.msra.mxu0 %v2068_v55 }
 0x577   : > { %1985 = vmatprep.subr.bf16.mxu0 %v2183_v0  ;;  %v2072_v0 = vld [vmem:[%s2666_s5 + $0xc0] sm:$0xff]  }
 0x57a   : > { %1986 = vmatpush3.bf16.msra.mxu0 %v2069_v56 }
 0x57b   : > { %1865 = vmatprep.subr.bf16.mxu0 %v2072_v0 }
 0x630   : > { %v1010_v57 = vpop.f32.mrb[8].mxu0 }
 0x631   : > { %v1969_v59 = vpop.f32.mrb[9].mxu0 }
 0x632   : > { %v1013_v60 = vpop.f32.mrb[10].mxu0 }
 0x633   : > { %v1017_v61 = vpack.c.bf16 %v1013_v60, %v1010_v57  ;;  %v1970_v62 = vpop.f32.mrb[11].mxu0 }
 0x635   : > { %1988 = vmatmul.mubr.bf16.vlgmr.msra.gmra.mrb[12].mxu0 %v1017_v61 }
 0x636   : > { %1866 = vmatpush3.bf16.msra.mxu0 %v2073_v3 }
 0x637   : > { %1867 = vmatprep.subr.bf16.mxu0 %v2076_v6 }
 0x63a   : > { %1868 = vmatpush3.bf16.msra.mxu0 %v2077_v7 }
 0x63b   : > { %1869 = vmatprep.subr.bf16.mxu0 %v2080_v10 }
 0x63e   : > { %1870 = vmatpush3.bf16.msra.mxu0 %v2081_v11 }
 0x63f   : > { %1871 = vmatprep.subr.bf16.mxu0 %v2084_v14 }
 0x642   : > { %1872 = vmatpush3.bf16.msra.mxu0 %v2085_v15  ;;  %v1758_v15 = vld [vmem:[%s2667_s6] ss:$0 sm:$0xff] }
 0x643   : > { %1873 = vmatprep.subr.bf16.mxu0 %v2088_v18 }
 0x646   : > { %1874 = vmatpush3.bf16.msra.mxu0 %v2089_v19 }
 0x647   : > { %1875 = vmatprep.subr.bf16.mxu0 %v2092_v22 }
 0x64a   : > { %1876 = vmatpush3.bf16.msra.mxu0 %v2093_v24 }
 0x64b   : > { %1877 = vmatprep.subr.bf16.mxu0 %v2096_v25 }
 0x64e   : > { %1878 = vmatpush3.bf16.msra.mxu0 %v2097_v28 }
 0x64f   : > { %1879 = vmatprep.subr.bf16.mxu0 %v2100_v31 }
 0x652   : > { %1880 = vmatpush3.bf16.msra.mxu0 %v2101_v35 }
 0x708   : > { %v1120_v37 = vpop.f32.mrb[12].mxu0 }
 0x709   : > { %v1121_v39 = vadd.f32 %v1748_v36, %v1120_v37  ;;  %v1989_v40 = vpop.f32.mrb[13].mxu0 }
 0x70a   : > { %v1123_v2 = vpop.f32.mrb[14].mxu0 }
 0x70b   : > { %2115 = vtanh.f32 %v1121_v39  ;;  %v1124_v41 = vadd.f32 %v1749_v38, %v1123_v2  ;;  %v1990_v42 = vpop.f32.mrb[15].mxu0 }
 0x70d   : > { %2117 = vtanh.f32 %v1124_v41 }
 0x715   : > { %v2116_v43 = vpop.eup %2115 }
 0x716   : > { %v1129_v45 = vadd.f32 %v2116_v43, %v2348_v30  ;;  %v1131_v46 = vadd.f32 %v2116_v43, %v2346_v29 }
 0x717   : > { %v2118_v44 = vpop.eup %2117 }
 0x718   : > { %v1130_v47 = vadd.f32 %v2118_v44, %v2352_v33  ;;  %v1132_v48 = vadd.f32 %v2118_v44, %v2350_v32 }
 0x71a   : > { %v1133_v49 = vmax.f32 %v1129_v45, %v1130_v47  ;;  %v1140_v50 = vmax.f32 %v1131_v46, %v1132_v48 }
 0x71c   : > { %v1134_v51 = vrot.slane %v1133_v49, 4  ;;  %v1141_v52 = vrot.slane %v1140_v50, 4 }
 0x71e   : > { %v1135_v53 = vmax.f32 %v1133_v49, %v1134_v51  ;;  %v1142_v54 = vmax.f32 %v1140_v50, %v1141_v52 }
 0x720   : > { %v1136_v55 = vrot.slane %v1135_v53, 2  ;;  %v1143_v56 = vrot.slane %v1142_v54, 2 }
 0x722   : > { %v1137_v57 = vmax.f32 %v1135_v53, %v1136_v55  ;;  %v1144_v59 = vmax.f32 %v1142_v54, %v1143_v56 }
 0x724   : > { %v1138_v60 = vrot.slane %v1137_v57, 1  ;;  %v1145_v61 = vrot.slane %v1144_v59, 1 }
 0x726   : > { %v1139_v62 = vmax.f32 %v1137_v57, %v1138_v60  ;;  %v1146_v30 = vmax.f32 %v1144_v59, %v1145_v61 }
 0x728   : > { %v1162_v29 = vrot.slane %v1146_v30, %v2374_v58  ;;  %v1155_v33 = vrot.slane %v1139_v62, %v2374_v58 }
 0x72a   : > { %v1165_v63 = vrot.slane %v1162_v29, 7 }
 0x72c   : > { %v1166_v32 = vsel %vm571_vm2, %v1165_v63, %v1155_v33 }
 0x72d   : > { %v1167_v1 = vsel %vm573_vm3, %v1165_v63, %v1166_v32 }
 0x72e   : > { %v1168_v0 = vsel %vm575_vm4, %v1165_v63, %v1167_v1 }
 0x72f   : > { %v1169_v3 = vsel %vm577_vm5, %v1165_v63, %v1168_v0 }
 0x730   : > { %1171 = vst [vmem:[#allocation2 + $0x6] sm:$0x3] %v1169_v3 }
 0x737   : > { %v1172_v4 = vld [vmem:[#allocation2] sm:$0xff] }
 0x738   : > { %v1181_v5 = vrot.slane %v1172_v4, %v2374_v58  ;;  %v1174_v6 = vcombine.high %v1172_v4, %v1172_v4 }
 0x73a   : > { %v1189_v7 = vcombine.high %v1181_v5, %v1181_v5  ;;  %v1188_v8 = vrot.slane %v1174_v6, %v2374_v58  ;;  %v1195_v11 = vpack.c.bf16 %v1181_v5, %v1181_v5 }
 0x73c   : > { %v1196_v9 = vpack.c.bf16 %v1189_v7, %v1189_v7  ;;  %v1190_v10 = vcombine.high %v1188_v8, %v1188_v8  ;;  %v1197_v13 = vpack.c.bf16 %v1188_v8, %v1188_v8 }
 0x73e   : > { %1494 = vmatprep.mubr.bf16.mxu1 %v1196_v9  ;;  %v1198_v12 = vpack.c.bf16 %v1190_v10, %v1190_v10 }
 0x73f   : > { %1495 = vmatmul.mubr.bf16.vlgmr.msra.gmra.mrb[16].mxu1 %v1195_v11 }
 0x740   : > { %1534 = vmatprep.mubr.bf16.mxu0 %v1198_v12 }
 0x741   : > { %1535 = vmatmul.mubr.bf16.vlgmr.msra.gmra.mrb[16].mxu0 %v1197_v13 }
 0x812   : > { %v1859_v14 = vpop.f32.mrb[16].mxu1 }
 0x813   : > { %v1860_v16 = vpop.f32.mrb[17].mxu1 }
 0x814   : > { %v1861_v17 = vadd.f32 %v1860_v16, %v1859_v14  ;;  %v1862_v58 = vpop.f32.mrb[18].mxu1  ;;  %v1881_v18 = vpop.f32.mrb[16].mxu0 }
 0x815   : > { %v1863_v19 = vpop.f32.mrb[19].mxu1  ;;  %v1882_v20 = vpop.f32.mrb[17].mxu0 }
 0x816   : > { %v1497_v21 = vadd.f32 %v1861_v17, %v1758_v15  ;;  %v1883_v22 = vadd.f32 %v1882_v20, %v1881_v18  ;;  %v1884_v23 = vpop.f32.mrb[18].mxu0 }
 0x817   : > { %v1885_v24 = vpop.f32.mrb[19].mxu0 }
 0x818   : > { %v1537_v25 = vadd.f32 %v1883_v22, %v1497_v21 }
 0x81a   : > { %v1542_v26 = vmax.f32 %v1537_v25, 0.0 }
 0x81c   : > { %1543 = vst [vmem:[%s316_s17] sm:$0x3] %v1542_v26 }
 0x81d   : > { %2132 = shalt.err (!%p2129_p3)
}
 0x81e   : > { %s2133_s18 = scalar_lea.hbm %s2619_s21, 32  ;;  %s2137_s15 = scalar_lea.hbm %s2668_s7, 128 }
 0x81f   : > { %p2134_p4 = scmp.ne.s32.totalorder %s2619_s21, %s2133_s18  ;;  %p2138_p9 = scmp.lt.u32.totalorder %s2619_s21, %s2668_s7 }
 0x820   : > { %p2139_p10 = scmp.lt.u32.totalorder %s2137_s15, %s2133_s18  ;;  %p2141_p12 = scmp.lt.u32.totalorder %s2133_s18, %s2619_s21 }
 0x821   : > { %p2135_p7 = pnand %p2134_p4, %p2266_p5 }
 0x822   : > { %p2140_p11 = por %p2139_p10, %p2138_p9 }
 0x823   : > { %p2136_p8 = pneg %p2135_p7 }
 0x824   : > { %p2142_p13 = por %p2141_p12, %p2140_p11 }
 0x826   : > { %p2143_p0 = pnand %p2142_p13, %p2136_p8 }
 0x828   : > { %2146 = shalt.err (!%p2143_p0)
}
 0x829   : > { %1991 = dma.vmem_to_hbm [thread:$0]  (%p2266_p5), %s2621_s13, 32, %s2619_s21, %s1545_s22  }
 0x82a PF: > { %p1997_p1 = scmp.ge.s32.totalorder %s2181_s27, 2  ;;  %s1570_s19 = sand.u32 1, %s2169_s24  }
 0x82b   : > { %s1571_s20 = scalar_lea.sflag [#allocation4], %s1570_s19 }
 0x82c   : > { %p1994_p2 = pnand %p1997_p1, %p2270_p6 }
 0x82e   : > { %2164 = dma.done.wait (!%p1994_p2), %s1571_s20, 32  }
 0x82f   : > { %2166 = vsyncadd (!%p1994_p2), %s1571_s20, 4294967264  ;;  %p17_p3 = scmp.ge.s32.totalorder %s2253_s30, 6   ;;  %s2671_s24 = smov %s2173_s25 }
 0x830   : > { %s2672_s25 = smov %s2177_s26  ;;  %s2673_s26 = smov %s2264_s10 }
 0x831   : > { %s2674_s27 = smov %s2253_s30  ;;  %19 = sbr.rel (!%p17_p3) target bundleno = 3 (0x3), region = 98 }
 0x838   :  { %1576 = vsyncpa [#allocation4], 1 }
 0x839   :  { %1578 = vsyncpa [#allocation4 + $0x1], 1 }

</bundles_post_ra>
